<compile_context>
chip_gen: v6e
topology: v6e:2x2x1
jax: 0.10.0
libtpu: 0.0.40
codegen_flags: <defaults>
</compile_context>

<pallas_src>
import functools

import jax
import jax.numpy as jnp
import numpy as np
from jax.experimental import pallas as pl
from jax.experimental.pallas import tpu as pltpu

_LANE = 128
_MAX_BLOCK_T = 65536  # diminishing bandwidth returns past ~64K lanes; bounds compile size


def _ce_mask_kernel(*refs, hw, n_t_half, has_weight):
    if has_weight:
        logits_ref, target_ref, weight_ref, out_ref, acc_ref, cls_ref = refs
    else:
        logits_ref, target_ref, out_ref, acc_ref, cls_ref = refs
        weight_ref = None

    t_i = pl.program_id(2)
    block_t = acc_ref.shape[1]

    @pl.when(t_i == 0)
    def _():
        acc_ref[...] = jnp.zeros_like(acc_ref)
        # Grid-invariant class indices, materialized once per image half instead of
        # regenerating a (C, T) broadcasted_iota on the VPU every pixel tile.
        cls_ref[...] = jax.lax.broadcasted_iota(jnp.int32, cls_ref.shape, 0)

    # Global pixel-tile index: the leading grid axis splits the pixel tiles into halves so
    # both v7x TensorCores have work even when N == 1.
    gt = pl.program_id(0) * n_t_half + t_i
    pix = gt * block_t + jax.lax.broadcasted_iota(jnp.int32, (1, block_t), 1)
    valid = pix < hw                                            # (1, T)

    x = logits_ref[0].astype(jnp.float32)                       # (C, T), classes on sublanes
    # Numerically stable logsumexp over the class (sublane) axis.  No pre-mask on x: the
    # ragged-tail lanes are removed below with a select, so garbage/NaN cannot leak.
    m = jnp.max(x, axis=0, keepdims=True)                       # (1, T)
    lse = m + jnp.log(jnp.sum(jnp.exp(x - m), axis=0, keepdims=True))

    # logits[target] via a one-hot compare against the cached class indices.
    tgt = target_ref[0].astype(jnp.int32)                       # (1, T)
    tgt_logit = jnp.sum(jnp.where(cls_ref[...] == tgt, x, 0.0), axis=0, keepdims=True)

    ce = lse - tgt_logit                                        # (1, T) per-pixel CE
    if has_weight:
        ce = ce * weight_ref[0].astype(jnp.float32)

    acc_ref[...] += jnp.where(valid, ce, 0.0)                   # select (not multiply)

    @pl.when(t_i == pl.num_programs(2) - 1)
    def _():
        # Single cross-lane reduce per image half, written to this half's partial slot.
        out_ref[0, 0] = jnp.sum(acc_ref[...], keepdims=True)


def _vmem_capacity_bytes():
    """Physical per-core VMEM; falls back to the smallest current generation (v7x)."""
    try:
        return int(pltpu.get_tpu_info().vmem_capacity_bytes)
    except Exception:
        return 64 * 1024 * 1024


def _choose_block_t(hw, max_bt):
    hw_ceil = pl.cdiv(hw, _LANE) * _LANE
    bt = max(_LANE, (min(max_bt, hw_ceil, _MAX_BLOCK_T) // _LANE) * _LANE)
    n_t = pl.cdiv(hw, bt)
    if n_t > 1 and n_t % 2 == 1:
        # Prefer an even tile count so the leading "halves" grid axis splits the pixel
        # tiles exactly (both TCs busy on v7x, zero phantom tiles on single-TC chips).
        bt2 = max(_LANE, pl.cdiv(pl.cdiv(hw, n_t + 1), _LANE) * _LANE)
        if pl.cdiv(hw, bt2) % 2 == 0:
            bt = bt2
    return bt


def ce_mask(logits_nchw, target_nhw, weight_nhw=None, *, block_t=None, buffers=2):
    """torch.mean(weight * nn.CrossEntropyLoss(reduction='none')(logits, target)).

    weight_nhw may be None.  target may be int8/int16/int32 and weight f32/bf16; narrow
    side-input dtypes are consumed directly (upcast in-register) to cut HBM bytes for
    small class counts.  `buffers=3` enables deeper pipelining (useful on v5e)."""
    N, C, H, W = logits_nchw.shape
    HW = H * W

    # Free, contiguous reshapes only: no transpose / f32 cast / padding of the big slab,
    # and no wrapper-side dtype casts (those would be an extra HBM round-trip).
    x = logits_nchw.reshape(N, C, HW)
    tgt = target_nhw.reshape(N, 1, HW)
    if (not jnp.issubdtype(tgt.dtype, jnp.integer)) or jnp.dtype(tgt.dtype).itemsize > 4:
        tgt = tgt.astype(jnp.int32)
    has_weight = weight_nhw is not None
    w = weight_nhw.reshape(N, 1, HW) if has_weight else None

    # --- VMEM accounting (sublane-padded, all operands, buffering included) -------------
    its_l = jnp.dtype(x.dtype).itemsize
    g_l = 32 // its_l                                      # sublane granule for the dtype
    lane_logits = pl.cdiv(C, g_l) * g_l * its_l            # bytes/lane, logits block
    lane_row = 32                                          # any 1-row block pads to 32 B/lane
    lane_cls = pl.cdiv(C, 8) * 8 * 4                       # cached class-iota scratch (int32)
    per_lane = int(buffers) * (lane_logits + lane_row + (lane_row if has_weight else 0)) \
        + lane_row + lane_cls                              # + f32 accumulator + cls scratch

    vmem_cap = _vmem_capacity_bytes()                      # 64 MiB v7x, 128 MiB v5e/v6e
    work_budget = vmem_cap // 4                            # keep working set clear of cap
    max_bt = max(_LANE, (work_budget // per_lane) // _LANE * _LANE)
    if block_t is not None:
        max_bt = min(max_bt, max(_LANE, (int(block_t) // _LANE) * _LANE))
    block_t = _choose_block_t(HW, max_bt)

    n_t = pl.cdiv(HW, block_t)
    n_halves = 2 if (n_t >= 2 and n_t % 2 == 0) else 1
    n_t_half = n_t // n_halves

    working_set = block_t * per_lane + (1 << 20)
    vmem_limit = int(min(vmem_cap * 3 // 4, max(16 << 20, 3 * working_set)))

    # --- specs ---------------------------------------------------------------------------
    pm = None if int(buffers) == 2 else pl.Buffered(int(buffers))

    def spec(shape, imap):
        if pm is None:
            return pl.BlockSpec(shape, imap)
        return pl.BlockSpec(shape, imap, pipeline_mode=pm)

    def in_map(h, n, t):
        return (n, 0, h * n_t_half + t)

    in_specs = [spec((1, C, block_t), in_map),      # logits, native dtype
                spec((1, 1, block_t), in_map)]      # target, native (narrow) int dtype
    inputs = [x, tgt]
    if has_weight:
        in_specs.append(spec((1, 1, block_t), in_map))
        inputs.append(w)

    kernel = functools.partial(_ce_mask_kernel, hw=HW, n_t_half=n_t_half,
                               has_weight=has_weight)

    partials = pl.pallas_call(
        kernel,
        out_shape=jax.ShapeDtypeStruct((n_halves, N, 1, 1), jnp.float32),
        grid_spec=pltpu.PrefetchScalarGridSpec(
            num_scalar_prefetch=0,
            grid=(n_halves, N, n_t_half),
            in_specs=in_specs,
            out_specs=pl.BlockSpec((1, 1, 1, 1), lambda h, n, t: (h, n, 0, 0)),
            scratch_shapes=[pltpu.VMEM((1, block_t), jnp.float32),
                            pltpu.VMEM((C, block_t), jnp.int32)],
        ),
        compiler_params=pltpu.CompilerParams(
            dimension_semantics=("parallel", "parallel", "arbitrary"),
            vmem_limit_bytes=vmem_limit,
        ),
    )(*inputs)

    return jnp.sum(partials) / float(N * HW)


def _reference(logits_nchw, target_nhw, weight_nhw):
    # pure-JAX reference of torch.mean(weight * CrossEntropyLoss(reduction='none'))
    x = jnp.transpose(logits_nchw, (0, 2, 3, 1)).astype(jnp.float32)  # NHWC
    lse = jax.nn.logsumexp(x, axis=-1)
    tgt = jnp.take_along_axis(x, target_nhw[..., None].astype(jnp.int32), axis=-1)[..., 0]
    ce = lse - tgt
    if weight_nhw is not None:
        ce = weight_nhw.astype(jnp.float32) * ce
    return jnp.mean(ce)


if __name__ == "__main__":
    key = jax.random.PRNGKey(0)
    ks = jax.random.split(key, 8)

    # 1) primary small case: N=2, C=4, H=W=16 (f32 logits / int32 target / f32 weight)
    N, C, H, W = 2, 4, 16, 16
    logits = jax.random.normal(ks[0], (N, C, H, W), dtype=jnp.float32)
    target = jax.random.randint(ks[1], (N, H, W), 0, C, dtype=jnp.int32)
    weight = jax.random.uniform(ks[2], (N, H, W), dtype=jnp.float32)
    out = ce_mask(logits, target, weight)
    jax.block_until_ready(out)
    assert np.allclose(np.asarray(out), np.asarray(_reference(logits, target, weight)),
                       rtol=1e-5, atol=1e-5)

    # 2) weight=None branch (no ones array is ever built or DMA'd)
    out_nw = ce_mask(logits, target, None)
    jax.block_until_ready(out_nw)
    assert np.allclose(np.asarray(out_nw), np.asarray(_reference(logits, target, None)),
                       rtol=1e-5, atol=1e-5)

    # 3) ragged H*W (160 px) + forced 128-lane tiles: exercises the in-kernel tail mask,
    #    the two-halves parallel grid axis (n_t == 2), and narrow side-input dtypes
    #    (int16 target, bf16 weight) consumed natively to cut HBM traffic.
    H2, W2 = 16, 10
    logits2 = jax.random.normal(ks[3], (N, C, H2, W2), dtype=jnp.float32)
    target2 = jax.random.randint(ks[4], (N, H2, W2), 0, C).astype(jnp.int16)
    weight2 = jax.random.uniform(ks[5], (N, H2, W2), dtype=jnp.float32).astype(jnp.bfloat16)
    out2 = ce_mask(logits2, target2, weight2, block_t=128)
    jax.block_until_ready(out2)
    assert np.allclose(np.asarray(out2), np.asarray(_reference(logits2, target2, weight2)),
                       rtol=1e-5, atol=1e-5)

    # 4) odd tile count (n_t == 3) falls back to a single-half grid and accumulates across
    #    multiple tiles per image (no phantom tiles on single-TC v5e/v6e).
    H3, W3 = 16, 24
    logits3 = jax.random.normal(ks[6], (N, C, H3, W3), dtype=jnp.float32)
    target3 = jax.random.randint(ks[7], (N, H3, W3), 0, C, dtype=jnp.int32)
    out3 = ce_mask(logits3, target3, None, block_t=128)
    jax.block_until_ready(out3)
    assert np.allclose(np.asarray(out3), np.asarray(_reference(logits3, target3, None)),
                       rtol=1e-5, atol=1e-5)

    print("KERNEL_OK")
</pallas_src>

<mosaic_0001>
module attributes {stable_mosaic.version = 11 : i64} {
  func.func @_ce_mask_kernel(%arg0: i32, %arg1: i32, %arg2: i32, %arg3: memref<1x4x256xf32, #tpu.memory_space<vmem>>, %arg4: memref<1x1x256xi32, #tpu.memory_space<vmem>>, %arg5: memref<1x1x256xf32, #tpu.memory_space<vmem>>, %arg6: memref<1x1x1x1xf32, #tpu.memory_space<vmem>>, %arg7: memref<1x256xf32, #tpu.memory_space<vmem>>, %arg8: memref<4x256xi32, #tpu.memory_space<vmem>>) attributes {dimension_semantics = [#tpu.dimension_semantics<parallel>, #tpu.dimension_semantics<parallel>, #tpu.dimension_semantics<arbitrary>], iteration_bounds = array<i64: 1, 2, 1>, scalar_prefetch = 0 : i64, scratch_operands = 2 : i64, tpu.core_type = #tpu.core_type<tc>, window_params = [{transform_indices = @transform_0, window_bounds = array<i64: 1, 4, 256>}, {transform_indices = @transform_1, window_bounds = array<i64: 1, 1, 256>}, {transform_indices = @transform_2, window_bounds = array<i64: 1, 1, 256>}, {transform_indices = @transform_3, window_bounds = array<i64: 1, 1, 1, 1>}]} {
    %c0_i32 = arith.constant 0 : i32
    %0 = arith.cmpi eq, %arg2, %c0_i32 : i32
    %1 = arith.extui %0 : i1 to i32
    %c0_i32_0 = arith.constant 0 : i32
    %2 = arith.cmpi ne, %1, %c0_i32_0 : i32
    scf.if %2 {
      %cst_22 = arith.constant 0.000000e+00 : f32
      %43 = vector.broadcast %cst_22 : f32 to vector<1x256xf32>
      %c0_23 = arith.constant 0 : index
      %c0_24 = arith.constant 0 : index
      %44 = vector.load %arg7[%c0_23, %c0_24] : memref<1x256xf32, #tpu.memory_space<vmem>>, vector<1x256xf32>
      tpu.vector_store %arg7[%c0_23, %c0_24], %43 {strides = array<i32>} : memref<1x256xf32, #tpu.memory_space<vmem>>, vector<1x256xf32>,
      %45 = tpu.iota {dimensions = array<i32: 0>} : vector<4x256xi32>
      %c0_25 = arith.constant 0 : index
      %c0_26 = arith.constant 0 : index
      %46 = vector.load %arg8[%c0_25, %c0_26] : memref<4x256xi32, #tpu.memory_space<vmem>>, vector<4x256xi32>
      tpu.vector_store %arg8[%c0_25, %c0_26], %45 {strides = array<i32>} : memref<4x256xi32, #tpu.memory_space<vmem>>, vector<4x256xi32>,
    } else {
    }
    %c1_i32 = arith.constant 1 : i32
    %3 = arith.muli %arg0, %c1_i32 : i32
    %4 = arith.addi %3, %arg2 : i32
    %c256_i32 = arith.constant 256 : i32
    %5 = arith.muli %4, %c256_i32 : i32
    %6 = tpu.iota {dimensions = array<i32: 1>} : vector<1x256xi32>
    %7 = vector.broadcast %5 : i32 to vector<1x256xi32>
    %8 = arith.addi %7, %6 : vector<1x256xi32>
    %c256_i32_1 = arith.constant 256 : i32
    %9 = vector.broadcast %c256_i32_1 : i32 to vector<1x256xi32>
    %10 = arith.cmpi slt, %8, %9 : vector<1x256xi32>
    %c0 = arith.constant 0 : index
    %c0_2 = arith.constant 0 : index
    %c0_3 = arith.constant 0 : index
    %11 = vector.load %arg3[%c0, %c0_2, %c0_3] : memref<1x4x256xf32, #tpu.memory_space<vmem>>, vector<1x4x256xf32>
    %12 = vector.shape_cast %11 : vector<1x4x256xf32> to vector<4x256xf32>
    %cst = arith.constant dense<0xFF800000> : vector<256xf32>
    %13 = vector.multi_reduction <maximumf>, %12, %cst [0] : vector<4x256xf32> to vector<256xf32>
    %14 = vector.shape_cast %13 : vector<256xf32> to vector<1x256xf32>
    %15 = vector.broadcast %14 : vector<1x256xf32> to vector<4x256xf32>
    %16 = arith.subf %12, %15 : vector<4x256xf32>
    %17 = math.exp %16 : vector<4x256xf32>
    %cst_4 = arith.constant dense<0.000000e+00> : vector<256xf32>
    %18 = vector.multi_reduction <add>, %17, %cst_4 [0] : vector<4x256xf32> to vector<256xf32>
    %19 = vector.shape_cast %18 : vector<256xf32> to vector<1x256xf32>
    %20 = math.log %19 : vector<1x256xf32>
    %21 = arith.addf %14, %20 : vector<1x256xf32>
    %c0_5 = arith.constant 0 : index
    %c0_6 = arith.constant 0 : index
    %c0_7 = arith.constant 0 : index
    %22 = vector.load %arg4[%c0_5, %c0_6, %c0_7] : memref<1x1x256xi32, #tpu.memory_space<vmem>>, vector<1x1x256xi32>
    %23 = vector.shape_cast %22 : vector<1x1x256xi32> to vector<1x256xi32>
    %c0_8 = arith.constant 0 : index
    %c0_9 = arith.constant 0 : index
    %24 = vector.load %arg8[%c0_8, %c0_9] : memref<4x256xi32, #tpu.memory_space<vmem>>, vector<4x256xi32>
    %25 = vector.broadcast %23 : vector<1x256xi32> to vector<4x256xi32>
    %26 = arith.cmpi eq, %24, %25 : vector<4x256xi32>
    %cst_10 = arith.constant 0.000000e+00 : f32
    %27 = vector.broadcast %cst_10 : f32 to vector<4x256xf32>
    %28 = arith.select %26, %12, %27 : vector<4x256xi1>, vector<4x256xf32>
    %cst_11 = arith.constant dense<0.000000e+00> : vector<256xf32>
    %29 = vector.multi_reduction <add>, %28, %cst_11 [0] : vector<4x256xf32> to vector<256xf32>
    %30 = vector.shape_cast %29 : vector<256xf32> to vector<1x256xf32>
    %31 = arith.subf %21, %30 : vector<1x256xf32>
    %c0_12 = arith.constant 0 : index
    %c0_13 = arith.constant 0 : index
    %c0_14 = arith.constant 0 : index
    %32 = vector.load %arg5[%c0_12, %c0_13, %c0_14] : memref<1x1x256xf32, #tpu.memory_space<vmem>>, vector<1x1x256xf32>
    %33 = vector.shape_cast %32 : vector<1x1x256xf32> to vector<1x256xf32>
    %34 = arith.mulf %31, %33 : vector<1x256xf32>
    %c0_15 = arith.constant 0 : index
    %c0_16 = arith.constant 0 : index
    %35 = vector.load %arg7[%c0_15, %c0_16] : memref<1x256xf32, #tpu.memory_space<vmem>>, vector<1x256xf32>
    %cst_17 = arith.constant 0.000000e+00 : f32
    %36 = vector.broadcast %cst_17 : f32 to vector<1x256xf32>
    %37 = arith.select %10, %34, %36 : vector<1x256xi1>, vector<1x256xf32>
    %38 = arith.addf %35, %37 : vector<1x256xf32>
    %c0_18 = arith.constant 0 : index
    %c0_19 = arith.constant 0 : index
    %39 = vector.load %arg7[%c0_18, %c0_19] : memref<1x256xf32, #tpu.memory_space<vmem>>, vector<1x256xf32>
    tpu.vector_store %arg7[%c0_18, %c0_19], %38 {strides = array<i32>} : memref<1x256xf32, #tpu.memory_space<vmem>>, vector<1x256xf32>,
    %c0_i32_20 = arith.constant 0 : i32
    %40 = arith.cmpi eq, %arg2, %c0_i32_20 : i32
    %41 = arith.extui %40 : i1 to i32
    %c0_i32_21 = arith.constant 0 : i32
    %42 = arith.cmpi ne, %41, %c0_i32_21 : i32
    scf.if %42 {
      %c0_22 = arith.constant 0 : index
      %c0_23 = arith.constant 0 : index
      %43 = vector.load %arg7[%c0_22, %c0_23] : memref<1x256xf32, #tpu.memory_space<vmem>>, vector<1x256xf32>
      %44 = vector.shape_cast %43 : vector<1x256xf32> to vector<1x1x256xf32>
      %cst_24 = arith.constant dense<0.000000e+00> : vector<1xf32>
      %45 = vector.multi_reduction <add>, %44, %cst_24 [1, 2] : vector<1x1x256xf32> to vector<1xf32>
      %46 = vector.shape_cast %45 : vector<1xf32> to vector<1x1x1xf32>
      %47 = vector.extract %46[0, 0, 0] : f32 from vector<1x1x1xf32>
      %48 = vector.broadcast %47 : f32 to vector<1x1xf32>
      %c0_25 = arith.constant 0 : index
      %c0_26 = arith.constant 0 : index
      %c0_27 = arith.constant 0 : index
      %c0_28 = arith.constant 0 : index
      %49 = vector.load %arg6[%c0_25, %c0_26, %c0_27, %c0_28] : memref<1x1x1x1xf32, #tpu.memory_space<vmem>>, vector<1x1x1x1xf32>
      %50 = vector.shape_cast %49 : vector<1x1x1x1xf32> to vector<1x1xf32>
      %51 = vector.shape_cast %48 : vector<1x1xf32> to vector<1x1x1x1xf32>
      tpu.vector_store %arg6[%c0_25, %c0_26, %c0_27, %c0_28], %51 {strides = array<i32>} : memref<1x1x1x1xf32, #tpu.memory_space<vmem>>, vector<1x1x1x1xf32>,
    } else {
    }
    return
  }
  func.func @transform_0(%arg0: i32, %arg1: i32, %arg2: i32) -> (i32, i32, i32) {
    %c1_i32 = arith.constant 1 : i32
    %0 = arith.muli %arg0, %c1_i32 : i32
    %1 = arith.addi %0, %arg2 : i32
    %c0_i32 = arith.constant 0 : i32
    %c0_i32_0 = arith.constant 0 : i32
    return %arg1, %c0_i32, %1 : i32, i32, i32
  }
  func.func @transform_1(%arg0: i32, %arg1: i32, %arg2: i32) -> (i32, i32, i32) {
    %c1_i32 = arith.constant 1 : i32
    %0 = arith.muli %arg0, %c1_i32 : i32
    %1 = arith.addi %0, %arg2 : i32
    %c0_i32 = arith.constant 0 : i32
    %c0_i32_0 = arith.constant 0 : i32
    return %arg1, %c0_i32, %1 : i32, i32, i32
  }
  func.func @transform_2(%arg0: i32, %arg1: i32, %arg2: i32) -> (i32, i32, i32) {
    %c1_i32 = arith.constant 1 : i32
    %0 = arith.muli %arg0, %c1_i32 : i32
    %1 = arith.addi %0, %arg2 : i32
    %c0_i32 = arith.constant 0 : i32
    %c0_i32_0 = arith.constant 0 : i32
    return %arg1, %c0_i32, %1 : i32, i32, i32
  }
  func.func @transform_3(%arg0: i32, %arg1: i32, %arg2: i32) -> (i32, i32, i32, i32) {
    %c0_i32 = arith.constant 0 : i32
    %c0_i32_0 = arith.constant 0 : i32
    %c0_i32_1 = arith.constant 0 : i32
    return %arg0, %arg1, %c0_i32, %c0_i32_0 : i32, i32, i32, i32
  }
}

</mosaic_0001>

<bundles_post_ra>
// kernel: tpu_custom_call.1
= control target key start
LH: loop header
LB: loop body
LE: loop exit
PB: predicated region body
PF: predicated region fallthrough
CT: control target
= control target key end

     0   :  { %s1086_s0 = inlined_call_operand.hbm [shape: f32[2,4,256], index: 0, kind: input, shape index: {}]   ;;  %s1087_s1 = inlined_call_operand.hbm [shape: s32[2,1,256], index: 1, kind: input, shape index: {}]   ;;  %s1088_s2 = inlined_call_operand.hbm [shape: f32[2,1,256], index: 2, kind: input, shape index: {}]   ;;  %s1089_s3 = inlined_call_operand.vmem [shape: f32[1,2,1,1], index: 3, kind: output, shape index: {}]  }
   0x1   :  { %1091 = sst [smem:[#allocation11_spill]] %s1087_s1 }
   0x2   :  { %8 = vsyncpa [#allocation5], 0 }
   0x3   :  { %10 = vsyncpa [#allocation5 + $0x1], 0 }
   0x4   :  { %11 = vsyncpa [#allocation7], 0 }
   0x5   :  { %13 = vsyncpa [#allocation7 + $0x1], 0  ;;  %s902_s12 = smov 0   ;;  %s904_s13 = smov 0  }
   0x6   :  { %s906_s14 = smov 0   ;;  %s908_s15 = smov 0  }
   0x7   :  { %s910_s16 = smov 0   ;;  %s912_s17 = smov 0  }
   0x8 LB: > { %s1090_s18 = sadd.s32 4294967295, %s874_s17   ;;  %s34_s19 = sadd.s32 1, %s870_s16  ;;  %s874_s17 = sphi %s912_s17, %s19_s17   ;;  %s870_s16 = sphi %s910_s16, %s1103_s16   ;;  %s866_s15 = sphi %s908_s15, %s1102_s15   ;;  %s862_s14 = sphi %s906_s14, %s1101_s14   ;;  %s858_s13 = sphi %s904_s13, %s1100_s13   ;;  %s854_s12 = sphi %s902_s12, %s1099_s12  }
   0x9   : > { %p36_p0 = scmp.ge.s32.totalorder %s34_s19, 2  ;;  %s49_s20 = sadd.s32 1, %s862_s14 }
   0xa   : > { %p56_p1 = scmp.ne.s32.totalorder %s862_s14, %s858_s13  ;;  %p57_p2 = scmp.eq.s32.totalorder %s874_s17, 0 }
   0xb   : > { %s1105_s19 = smov (%p36_p0, %s34_s19), 0  ;;  %p62_p4 = scmp.ne.s32.totalorder %s858_s13, %s854_s12 }
   0xc   : > { %p58_p3 = por %p57_p2, %p56_p1  ;;  %s44_s21 = ssub.s32 %s870_s16, %s1105_s19 }
   0xd   : > { %p63_p5 = scmp.eq.s32.totalorder %s1090_s18, 0  ;;  %p47_p6 = scmp.eq.s32.totalorder %s44_s21, 0 }
   0xe   : > { %p677_p8 = scmp.lt.s32.totalorder %s874_s17, 2  ;;  %s952_s24 = sand.u32 1, %s862_s14  }
   0xf   : > { %p943_p7 = por %p63_p5, %p62_p4  ;;  %s196_s26 = sand.u32 1, %s874_s17  }
  0x10   : > { %s949_s23 = scalar_select %p47_p6, %s862_s14, %s49_s20  }
  0x11   : > { %p954_p9 = pnand %p677_p8, %p58_p3  ;;  %s644_s27 = sshll.u32 %s952_s24, 1 }
  0x12   : > { %s657_s28 = sshll.u32 %s870_s16, 5  ;;  %s1094_s1 = sld [smem:[#allocation11_spill]] }
  0x13   : > { %s200_s5 = scalar_lea.vmem [#allocation6], %s644_s27  ;;  %s966_s7 = scalar_lea.sflag [#allocation7], %s196_s26 }
  0x14   : > { %s211_s6 = sshll.u32 %s200_s5, 4  ;;  %p738_p10 = pneg %p954_p9  ;;  %s212_s6 = int_to_ptr.vmem [resolvable:$true] %s211_s6 }
  0x15   : > { %s749_s8 = scalar_lea.vmem %s212_s6, 32  ;;  %s876_s9 = smov [#allocation6]  }
  0x16   : > { %p750_p11 = scmp.ne.s32.totalorder %s212_s6, %s749_s8  ;;  %s754_s10 = sshll.u32 %s876_s9, 4  ;;  %s755_s10 = int_to_ptr.vmem [resolvable:$false] %s754_s10 }
  0x17   : > { %s756_s11 = scalar_lea.vmem %s755_s10, 64  ;;  %p757_p0 = scmp.lt.s32.totalorder %s212_s6, %s755_s10 }
  0x18   : > { %s209_s4 = scalar_lea.hbm %s1094_s1, %s657_s28  ;;  %p752_p12 = pnand %p750_p11, %p738_p10 }
  0x19   : > { %p758_p1 = scmp.lt.s32.totalorder %s756_s11, %s749_s8 }
  0x1a   : > { %p753_p13 = pneg %p752_p12 }
  0x1b   : > { %p759_p2 = por %p758_p1, %p757_p0 }
  0x1d   : > { %p760_p3 = pnand %p759_p2, %p753_p13 }
  0x1f   : > { %763 = shalt.err (!%p760_p3)
}
  0x20   : > { %673 = dma.hbm_to_vmem [thread:$0]  (!%p954_p9), %s209_s4, 32, %s212_s6, %s966_s7  }
  0x21   : > { %s979_s21 = scalar_lea.hbm %s1088_s2, %s657_s28  ;;  %p650_p4 = scmp.ge.s32.totalorder %s874_s17, 1 }
  0x22   : > { %p238_p5 = scmp.lt.s32.totalorder %s874_s17, 3  ;;  %s641_s29 = sshll.u32 %s952_s24, 3 }
  0x23   : > { %s656_s30 = sshll.u32 %s870_s16, 7  ;;  %s178_s10 = scalar_lea.vmem [#allocation4], %s641_s29 }
  0x24   : > { %p983_p6 = pnand %p650_p4, %p238_p5  ;;  %s187_s9 = scalar_lea.hbm %s1086_s0, %s656_s30 }
  0x25   : > { %s189_s4 = sshll.u32 %s178_s10, 4  ;;  %s222_s6 = scalar_lea.vmem [#allocation8], %s644_s27  ;;  %s190_s4 = int_to_ptr.vmem [resolvable:$true] %s189_s4 }
  0x26   : > { %s233_s11 = sshll.u32 %s222_s6, 4  ;;  %s175_s28 = scalar_lea.sflag [#allocation5], %s952_s24  ;;  %s234_s11 = int_to_ptr.vmem [resolvable:$true] %s233_s11 }
  0x27   : > { %s777_s12 = scalar_lea.vmem %s190_s4, 128  ;;  %s877_s20 = smov [#allocation4]  }
  0x28   : > { %p778_p8 = scmp.ne.s32.totalorder %s190_s4, %s777_s12  ;;  %s782_s18 = sshll.u32 %s877_s20, 4  ;;  %s783_s18 = int_to_ptr.vmem [resolvable:$false] %s782_s18 }
  0x29   : > { %s784_s1 = scalar_lea.vmem %s783_s18, 256  ;;  %p785_p13 = scmp.lt.s32.totalorder %s190_s4, %s783_s18 }
  0x2a   : > { %p780_p11 = pnand %p778_p8, %p738_p10  ;;  %p786_p0 = scmp.lt.s32.totalorder %s784_s1, %s777_s12 }
  0x2c   : > { %p781_p12 = pneg %p780_p11  ;;  %p787_p1 = por %p786_p0, %p785_p13 }
  0x2e   : > { %p788_p2 = pnand %p787_p1, %p781_p12 }
  0x30   : > { %791 = shalt.err (!%p788_p2)
}
  0x31   : > { %670 = dma.hbm_to_vmem [thread:$0]  (!%p954_p9), %s187_s9, 128, %s190_s4, %s175_s28  }
  0x32   : > { %s805_s24 = scalar_lea.vmem %s234_s11, 32  ;;  %s878_s27 = smov [#allocation8]  }
  0x33   : > { %p806_p3 = scmp.ne.s32.totalorder %s234_s11, %s805_s24  ;;  %s810_s29 = sshll.u32 %s878_s27, 4  ;;  %s811_s29 = int_to_ptr.vmem [resolvable:$false] %s810_s29 }
  0x34   : > { %s812_s30 = scalar_lea.vmem %s811_s29, 64  ;;  %p813_p8 = scmp.lt.s32.totalorder %s234_s11, %s811_s29 }
  0x35   : > { %p808_p4 = pnand %p806_p3, %p738_p10  ;;  %p814_p11 = scmp.lt.s32.totalorder %s812_s30, %s805_s24 }
  0x37   : > { %p809_p5 = pneg %p808_p4  ;;  %p815_p13 = por %p814_p11, %p813_p8 }
  0x39   : > { %p816_p12 = pnand %p815_p13, %p809_p5 }
  0x3b   : > { %819 = shalt.err (!%p816_p12)
}
  0x3c   : > { %676 = dma.hbm_to_vmem [thread:$0]  (!%p954_p9), %s979_s21, 32, %s234_s11, %s966_s7  }
  0x3d   : > { %242 = sbr.rel (%p983_p6) target bundleno = 367 (0x16f), region = 32  ;;  %s1010_s1 = sand.u32 (!%p983_p6), 1, %s858_s13  }
  0x3e   : > { %s651_s18 = sshll.u32 (!%p983_p6), %s1010_s1, 3  ;;  %s245_s5 = scalar_lea.sflag (!%p983_p6), [#allocation5], %s1010_s1 }
  0x3f   : > { %s248_s8 = scalar_lea.vmem (!%p983_p6), [#allocation4], %s651_s18 }
  0x42   : > { %845 = dma.done.wait (%p943_p7), %s245_s5, 128  }
  0x43   : > { %847 = vsyncadd (%p943_p7), %s245_s5, 4294967168  ;;  %s1096_s25 = sadd.s32 4294967295, %s874_s17   ;;  %s652_s21 = sshll.u32 %s1010_s1, 1 }
  0x44   : > { %s253_s7 = sand.u32 1, %s1096_s25   ;;  %s1023_s9 = scalar_lea.vmem [#allocation6], %s652_s21 }
  0x45   : > { %s254_s26 = scalar_lea.sflag [#allocation7], %s253_s7 }
  0x46   : > { %849 = dma.done.wait (%p943_p7), %s254_s26, 64  }
  0x47   : > { %851 = vsyncadd (%p943_p7), %s254_s26, 4294967232  ;;  %v318_v0 = vlaneseq  ;;  %v879_v2 = vmov 0.0   ;;  %vm347_vm1 = vcmask 1043456   ;;  %v343_v3 = vld [vmem:[%s248_s8] sm:$0xff]  ;;  %v880_v20 = vmov 839922192  }
  0x48   : > { %v345_v4 = vcombine.high %v343_v3, %v343_v3  ;;  %v348_v5 = vsel %vm347_vm1, %v343_v3, -inf  ;;  %v326_v21 = vunpack.c.l.s4 %v880_v20  ;;  %v392_v28 = vld [vmem:[%s1023_s9] sm:$0x3]  ;;  %s266_s22 = scalar_lea.vmem [#allocation8], %s652_s21  ;;  %vm480_vm3 = vcmask 1040384   ;;  %p309_p7 = scmp.lt.s32.totalorder %s866_s15, 1 }
  0x49   : > { %vm1029_vm0 = vcmp.lt.s32.totalorder %v318_v0, 256  ;;  %v349_v6 = vrot.slane %v348_v5, 4  ;;  %v1037_v19 = vshrl.u32 %v318_v0, 7  ;;  %vm494_vm4 = vcmask 0  }
  0x4a   : > { %322 = vst.msk [vmem:[#allocation2] sm:$0x3] %vm1029_vm0, %v879_v2  ;;  %v355_v7 = vsel %vm347_vm1, %v345_v4, -inf  ;;  %v327_v24 = vunpack.c.0.s8 %v326_v21  ;;  %v424_v2 = vld [vmem:[%s266_s22] sm:$0x3]  ;;  %s1107_s15 = smov (!%p309_p7, %s866_s15), 1 }
  0x4b   : > { %v350_v8 = vmax.f32 %v348_v5, %v349_v6  ;;  %v356_v9 = vrot.slane %v355_v7, 4  ;;  %v1040_v26 = vsub.s32 0, %v1037_v19  ;;  %v1043_v27 = vsub.s32 1, %v1037_v19  ;;  %s313_s6 = scalar_lea.vmem %s1089_s3, %s1107_s15 }
  0x4c   : > { %v330_v29 = vsub.s32 %v327_v24, %v1037_v19  ;;  %v881_v5 = vmov 1966171168  }
  0x4d   : > { %v351_v10 = vrot.slane %v350_v8, 2  ;;  %v357_v11 = vmax.f32 %v355_v7, %v356_v9  ;;  %v397_v30 = vrot.slane %v392_v28, %v1040_v26  ;;  %v401_v31 = vrot.slane %v392_v28, %v1043_v27 }
  0x4e   : > { %v331_v32 = vrot.slane %v1037_v19, %v330_v29  ;;  %v445_v6 = vunpack.c.l.s4 %v881_v5 }
  0x4f   : > { %v352_v12 = vmax.f32 %v350_v8, %v351_v10  ;;  %v358_v13 = vrot.slane %v357_v11, 2  ;;  %v402_v33 = vcombine.low %v397_v30, %v401_v31 }
  0x51   : > { %v353_v14 = vrot.slane %v352_v12, 1  ;;  %v359_v15 = vmax.f32 %v357_v11, %v358_v13  ;;  %vm403_vm2 = vcmp.eq.s32.totalorder %v331_v32, %v402_v33  ;;  %v429_v11 = vrot.slane %v424_v2, %v1040_v26 }
  0x52   : > { %v404_v35 = vsel %vm403_vm2, %v343_v3, 0.0 }
  0x53   : > { %v354_v16 = vmax.f32 %v352_v12, %v353_v14  ;;  %v360_v17 = vrot.slane %v359_v15, 1  ;;  %v406_v40 = vcombine.high %v404_v35, %v404_v35  ;;  %v408_v43 = vsel %vm347_vm1, %v404_v35, 0.0 }
  0x54   : > { %v409_v49 = vrot.slane %v408_v43, 4  ;;  %v433_v14 = vrot.slane %v424_v2, %v1043_v27 }
  0x55   : > { %v361_v18 = vmax.f32 %v359_v15, %v360_v17  ;;  %v415_v46 = vsel %vm347_vm1, %v406_v40, 0.0  ;;  %v446_v15 = vunpack.c.0.s8 %v445_v6 }
  0x56   : > { %v416_v52 = vrot.slane %v415_v46, 4  ;;  %v410_v55 = vadd.f32 %v409_v49, %v408_v43 }
  0x57   : > { %v364_v22 = vcombine.low %v354_v16, %v361_v18 }
  0x58   : > { %v417_v57 = vadd.f32 %v416_v52, %v415_v46  ;;  %v411_v58 = vrot.slane %v410_v55, 2 }
  0x59   : > { %v366_v23 = vsub.f32 %v343_v3, %v364_v22  ;;  %v449_v22 = vsub.s32 %v446_v15, %v1037_v19 }
  0x5a   : > { %v418_v59 = vrot.slane %v417_v57, 2  ;;  %v412_v60 = vadd.f32 %v411_v58, %v410_v55 }
  0x5b   : > { %v367_v25 = vmul.f32 1.442695, %v366_v23 }
  0x5c   : > { %v419_v61 = vadd.f32 %v418_v59, %v417_v57  ;;  %v413_v62 = vrot.slane %v412_v60, 1 }
  0x5d   : > { %730 = vpow2.f32 %v367_v25  ;;  %v438_v25 = vld [vmem:[#allocation2] sm:$0x3] }
  0x5e   : > { %v420_v63 = vrot.slane %v419_v61, 1  ;;  %v414_v4 = vadd.f32 %v413_v62, %v412_v60 }
  0x60   : > { %v421_v10 = vadd.f32 %v420_v63, %v419_v61 }
  0x6a   : > { %v731_v34 = vpop.eup %730 }
  0x6b   : > { %v370_v36 = vcombine.high %v731_v34, %v731_v34  ;;  %v372_v37 = vsel %vm347_vm1, %v731_v34, 0.0 }
  0x6c   : > { %v373_v38 = vrot.slane %v372_v37, 4 }
  0x6d   : > { %v379_v39 = vsel %vm347_vm1, %v370_v36, 0.0 }
  0x6e   : > { %v374_v41 = vadd.f32 %v373_v38, %v372_v37  ;;  %v380_v42 = vrot.slane %v379_v39, 4 }
  0x70   : > { %v375_v44 = vrot.slane %v374_v41, 2  ;;  %v381_v45 = vadd.f32 %v380_v42, %v379_v39 }
  0x72   : > { %v376_v47 = vadd.f32 %v375_v44, %v374_v41  ;;  %v382_v48 = vrot.slane %v381_v45, 2 }
  0x74   : > { %v377_v50 = vrot.slane %v376_v47, 1  ;;  %v383_v51 = vadd.f32 %v382_v48, %v381_v45 }
  0x76   : > { %v378_v53 = vadd.f32 %v377_v50, %v376_v47  ;;  %v384_v54 = vrot.slane %v383_v51, 1 }
  0x78   : > { %v385_v56 = vadd.f32 %v384_v54, %v383_v51  ;;  %732 = vlog2.f32 %v378_v53 }
  0x7a   : > { %734 = vlog2.f32 %v385_v56 }
  0x85   : > { %v733_v0 = vpop.eup %732 }
  0x86   : > { %v387_v3 = vmul.f32 0.6931472, %v733_v0 }
  0x87   : > { %v735_v7 = vpop.eup %734 }
  0x88   : > { %v389_v8 = vmul.f32 0.6931472, %v735_v7  ;;  %v390_v9 = vadd.f32 %v387_v3, %v354_v16 }
  0x8a   : > { %v391_v12 = vadd.f32 %v389_v8, %v361_v18  ;;  %v422_v13 = vsub.f32 %v390_v9, %v414_v4 }
  0x8c   : > { %v423_v17 = vsub.f32 %v391_v12, %v421_v10  ;;  %v436_v20 = vmul.f32 %v429_v11, %v422_v13 }
  0x8e   : > { %v437_v21 = vmul.f32 %v433_v14, %v423_v17 }
  0x90   : > { %v443_v23 = vcombine.low %v436_v20, %v437_v21 }
  0x92   : > { %v450_v24 = vrot.slane %v443_v23, %v449_v22 }
  0x94   : > { %v457_v28 = vrot.slane %v450_v24, %v449_v22 }
  0x96   : > { %v459_v29 = vadd.f32 %v457_v28, %v438_v25 }
  0x98   : > { %464 = vst.msk [vmem:[#allocation2] sm:$0x3] %vm1029_vm0, %v459_v29 }
  0x9f   : > { %v468_v16 = vld [vmem:[#allocation2] sm:$0x3] }
  0xa0   : > { %v473_v18 = vrot.slane %v468_v16, %v1040_v26  ;;  %v477_v30 = vrot.slane %v468_v16, %v1043_v27 }
  0xa2   : > { %v481_v31 = vsel %vm480_vm3, %v473_v18, 0.0  ;;  %v482_v32 = vsel %vm480_vm3, %v477_v30, 0.0 }
  0xa3   : > { %v483_v33 = vadd.f32 %v482_v32, %v481_v31 }
  0xa5   : > { %484 = vadd.xlane.f32.xlu0 %v483_v33 }
 0x12e   : > { %v485_v19 = vpop.xlane.xlu0 %484 }
 0x12f   : > { %v486_v34 = vrot.slane %v485_v19, 4 }
 0x131   : > { %v487_v35 = vadd.f32 %v486_v34, %v485_v19 }
 0x133   : > { %v488_v36 = vrot.slane %v487_v35, 2 }
 0x135   : > { %v489_v37 = vadd.f32 %v488_v36, %v487_v35 }
 0x137   : > { %v490_v38 = vrot.slane %v489_v37, 1 }
 0x139   : > { %v491_v1 = vadd.f32 %v490_v38, %v489_v37 }
 0x13b   : > { %659 = vpush %v491_v1 }
 0x16c   : > { %s660_s11 = spop %659 }
 0x16d   : > { %v493_v26 = vstv %s660_s11 }
 0x16e   : > { %495 = vst.msk [vmem:[%s313_s6] sm:$0x1] %vm494_vm4, %v493_v26 }
 0x16f PF: > { %s19_s17 = sadd.s32 1, %s874_s17   ;;  %s1099_s12 = smov %s858_s13 }
 0x170   : > { %p16_p9 = scmp.ge.s32.totalorder %s19_s17, 4   ;;  %s1100_s13 = smov %s862_s14 }
 0x171   : > { %s1101_s14 = smov %s949_s23  ;;  %s1102_s15 = smov %s870_s16 }
 0x172   : > { %s1103_s16 = smov %s1105_s19  ;;  %18 = sbr.rel (!%p16_p9) target bundleno = 8 (0x8), region = 104 }
 0x177   :  { %521 = vsyncpa [#allocation5], 1 }
 0x178   :  { %523 = vsyncpa [#allocation5 + $0x1], 1 }
 0x179   :  { %524 = vsyncpa [#allocation7], 1 }
 0x17a   :  { %526 = vsyncpa [#allocation7 + $0x1], 1 }

</bundles_post_ra>
